<compile_context>
chip_gen: v5e
topology: v5e:2x2
jax: 0.10.0
libtpu: 0.0.40
codegen_flags: <defaults>
</compile_context>

<pallas_src>
import functools

import jax
import jax.numpy as jnp
from jax.experimental import pallas as pl
from jax.experimental.pallas import tpu as pltpu

_OUT_PAD = 128  # lane-dense output width (col 0 = q1, col 1 = q2, rest zero)


def _round_up(x, m):
    return ((x + m - 1) // m) * m


def _buffered_one_supported():
    """Probe whether BlockSpec(pipeline_mode=pl.Buffered(1)) exists here."""
    if not hasattr(pl, "Buffered"):
        return False
    try:
        pl.BlockSpec((8, 128), lambda i: (0, 0), pipeline_mode=pl.Buffered(1))
        return True
    except TypeError:
        return False


_HAS_BUFFERED_1 = _buffered_one_supported()


def _critic_kernel(
    obs_ref, act_ref,
    # trunk: Linear(repr_dim, feature_dim) + LayerNorm + Tanh
    w_tr_ref, b_tr_ref, ln_w_ref, ln_b_ref,
    # fused Q1|Q2 MLP: layer1 concat along out-dim, layer2 stacked [2,H,H],
    # layer3 as per-head weight rows [2,H]
    w1h_ref, w1a_ref, b1_ref, w2_ref, b2_ref, w3_ref, b3_ref,
    # output: [bt, _OUT_PAD] (col0 = q1, col1 = q2)
    q_ref,
    # scratch: f32 trunk accumulator [bt, feature_dim]
    acc_ref,
    *, k_rem,
):
    k = pl.program_id(1)
    nk = pl.num_programs(1)

    @pl.when(k == 0)
    def _():
        acc_ref[...] = jnp.zeros_like(acc_ref)

    # ---- trunk contraction tile: acc += obs_tile @ W_tr_tile (f32 accum) ----
    obs_t = obs_ref[...]
    w_t = w_tr_ref[...]
    if k_rem:
        # Ragged final K tile (repr_dim % kt != 0): zero the overhanging
        # columns of obs and rows of W_tr in-register -- no HBM padding copy.
        kt = obs_t.shape[1]
        limit = jnp.where(k == nk - 1, k_rem, kt)
        col = jax.lax.broadcasted_iota(jnp.int32, obs_t.shape, 1)
        row = jax.lax.broadcasted_iota(jnp.int32, w_t.shape, 0)
        obs_t = jnp.where(col < limit, obs_t, jnp.zeros_like(obs_t))
        w_t = jnp.where(row < limit, w_t, jnp.zeros_like(w_t))
    acc_ref[...] += jnp.dot(obs_t, w_t, preferred_element_type=jnp.float32)

    @pl.when(k == nk - 1)
    def _():
        # ---- trunk epilogue: bias + LayerNorm(eps=1e-5, biased var) + tanh --
        x = acc_ref[...] + b_tr_ref[...]
        mean = jnp.mean(x, axis=-1, keepdims=True)
        xc = x - mean
        var = jnp.mean(xc * xc, axis=-1, keepdims=True)
        h = jnp.tanh(xc * jax.lax.rsqrt(var + 1e-5) * ln_w_ref[...] + ln_b_ref[...])

        # ---- fused Q1|Q2 layer 1: cat([h, act]) @ W1 == h@W1h + act@W1a ----
        z = jnp.dot(h.astype(w1h_ref.dtype), w1h_ref[...],
                    preferred_element_type=jnp.float32) + b1_ref[...]
        act = act_ref[...].astype(jnp.float32)
        w1a = w1a_ref[...].astype(jnp.float32)
        action_dim = w1a.shape[0]
        if action_dim <= 8:
            # tiny-K contraction on the VPU (broadcast FMAs) instead of an
            # almost-empty MXU pass
            for j in range(action_dim):
                z = z + act[:, j:j + 1] * w1a[j:j + 1, :]
        else:
            z = z + jnp.dot(act.astype(w1a_ref.dtype), w1a_ref[...],
                            preferred_element_type=jnp.float32)
        z = jnp.maximum(z, 0.0)

        # ---- layer 2: two independent [H,H] matmuls (no block-diag zeros) ---
        hid = w2_ref.shape[1]
        b2 = b2_ref[...]
        y1 = jnp.dot(z[:, :hid].astype(w2_ref.dtype), w2_ref[0],
                     preferred_element_type=jnp.float32) + b2[:, :hid]
        y2 = jnp.dot(z[:, hid:].astype(w2_ref.dtype), w2_ref[1],
                     preferred_element_type=jnp.float32) + b2[:, hid:]
        y1 = jnp.maximum(y1, 0.0)
        y2 = jnp.maximum(y2, 0.0)

        # ---- layer 3: one output column per head -> VPU mult + lane reduce --
        w3 = w3_ref[...].astype(jnp.float32)
        q1 = jnp.sum(y1 * w3[0:1, :], axis=-1, keepdims=True)
        q2 = jnp.sum(y2 * w3[1:2, :], axis=-1, keepdims=True)

        lane = jax.lax.broadcasted_iota(jnp.int32, q_ref.shape, 1)
        out = jnp.where(lane == 0, q1, jnp.where(lane == 1, q2, 0.0)) + b3_ref[...]
        q_ref[...] = out.astype(q_ref.dtype)


def critic_forward(obs, action, packed, *, batch_tile=128, k_tile=2048,
                   obs_dtype=None, single_buffer_consts=True):
    """obs: [B, repr_dim], action: [B, action_dim] -> (q1 [B,1], q2 [B,1])."""
    B, repr_dim = obs.shape
    action_dim = action.shape[1]
    feature_dim = packed["w_tr"].shape[1]
    hidden_dim = packed["w2"].shape[1]
    two_hid = 2 * hidden_dim

    if obs_dtype is not None and obs.dtype != obs_dtype:
        obs = obs.astype(obs_dtype)       # e.g. bf16 streaming of the trunk input

    # Batch: pad only to a multiple of 8 sublanes (cheap, usually a no-op).
    Bp = _round_up(B, 8)
    if Bp != B:
        obs = jnp.zeros((Bp, repr_dim), obs.dtype).at[:B].set(obs)
        action = jnp.zeros((Bp, action_dim), action.dtype).at[:B].set(action)
    bt = min(_round_up(min(batch_tile, Bp), 8), Bp)
    # v7x has 2 TensorCores: make sure the "parallel" batch axis has >= 2 tiles.
    if pl.cdiv(Bp, bt) < 2 and Bp >= 16:
        bt = _round_up(pl.cdiv(Bp, 2), 8)
    nb = pl.cdiv(Bp, bt)

    # Trunk reduction axis: never pad obs in HBM; ragged tail masked in-kernel.
    if repr_dim <= k_tile:
        kt = repr_dim
    else:
        kt = max(128, (k_tile // 128) * 128)
    nk = pl.cdiv(repr_dim, kt)
    k_rem = repr_dim % kt            # 0 => no masking needed

    use_single = bool(single_buffer_consts and _HAS_BUFFERED_1)

    def const(shape):
        zeros = (0,) * len(shape)
        idx = lambda i, k, _z=zeros: _z
        if use_single:
            # constant-index blocks never change -> single buffer halves VMEM
            return pl.BlockSpec(shape, idx, pipeline_mode=pl.Buffered(1))
        return pl.BlockSpec(shape, idx)

    in_specs = [
        pl.BlockSpec((bt, kt), lambda i, k: (i, k)),            # obs (streamed)
        pl.BlockSpec((bt, action_dim), lambda i, k: (i, 0)),    # action
        pl.BlockSpec((kt, feature_dim), lambda i, k: (k, 0)),   # trunk W (streamed)
        const((1, feature_dim)),                                # trunk bias
        const((1, feature_dim)),                                # LN weight
        const((1, feature_dim)),                                # LN bias
        const((feature_dim, two_hid)),                          # fused W1 (h part)
        const((action_dim, two_hid)),                           # fused W1 (act part)
        const((1, two_hid)),                                    # fused b1
        const((2, hidden_dim, hidden_dim)),                     # W2 stacked (q1,q2)
        const((1, two_hid)),                                    # fused b2
        const((2, hidden_dim)),                                 # W3 rows (q1,q2)
        const((1, _OUT_PAD)),                                   # b3 (lane padded)
    ]
    out_spec = pl.BlockSpec((bt, _OUT_PAD), lambda i, k: (i, 0))

    # VMEM budget: lane(128)/sublane(8)-padded block sizes x actual buffer counts.
    def blk_bytes(shape, dtype, nbuf):
        dims = list(shape)
        dims[-1] = _round_up(dims[-1], 128)
        if len(dims) >= 2:
            dims[-2] = _round_up(dims[-2], 8)
        n = 1
        for d in dims:
            n *= d
        return n * jnp.dtype(dtype).itemsize * nbuf

    cbuf = 1 if use_single else 2
    vmem_need = (
        blk_bytes((bt, kt), obs.dtype, 2)
        + blk_bytes((bt, action_dim), action.dtype, 2)
        + blk_bytes((kt, feature_dim), packed["w_tr"].dtype, 2)
        + 3 * blk_bytes((1, feature_dim), packed["b_tr"].dtype, cbuf)
        + blk_bytes((feature_dim, two_hid), packed["w1h"].dtype, cbuf)
        + blk_bytes((action_dim, two_hid), packed["w1a"].dtype, cbuf)
        + 2 * blk_bytes((1, two_hid), packed["b1"].dtype, cbuf)
        + blk_bytes((2, hidden_dim, hidden_dim), packed["w2"].dtype, cbuf)
        + blk_bytes((2, hidden_dim), packed["w3"].dtype, cbuf)
        + blk_bytes((1, _OUT_PAD), packed["b3"].dtype, cbuf)
        + blk_bytes((bt, _OUT_PAD), jnp.float32, 2)             # output tile
        + blk_bytes((bt, feature_dim), jnp.float32, 1)          # acc scratch
    )
    vmem_limit = max(vmem_need + (4 << 20), 16 << 20)
    if vmem_limit > (40 << 20):        # keep headroom under v7x's 64 MiB VMEM
        vmem_limit = min(vmem_need + (2 << 20), 96 << 20)

    kernel = functools.partial(_critic_kernel, k_rem=k_rem)
    out = pl.pallas_call(
        kernel,
        out_shape=jax.ShapeDtypeStruct((Bp, _OUT_PAD), jnp.float32),
        grid=(nb, nk),
        in_specs=in_specs,
        out_specs=out_spec,
        scratch_shapes=[pltpu.VMEM((bt, feature_dim), jnp.float32)],
        compiler_params=pltpu.CompilerParams(
            dimension_semantics=("parallel", "arbitrary"),
            vmem_limit_bytes=int(vmem_limit),
        ),
    )(obs, action,
      packed["w_tr"], packed["b_tr"], packed["ln_w"], packed["ln_b"],
      packed["w1h"], packed["w1a"], packed["b1"],
      packed["w2"], packed["b2"], packed["w3"], packed["b3"])

    return out[:B, 0:1], out[:B, 1:2]


def init_params(key, repr_dim, action_dim, feature_dim, hidden_dim):
    """Deterministic synthetic init; shapes follow the nn.Module __init__.
    (utils.weight_init is init-time only and does not affect forward math.)"""
    ks = jax.random.split(key, 16)

    def lin(kw, kb, fan_in, fan_out):
        w = jax.random.normal(kw, (fan_in, fan_out), jnp.float32) / jnp.sqrt(fan_in)
        b = 0.1 * jax.random.normal(kb, (1, fan_out), jnp.float32)
        return w, b

    p = {}
    p["w_tr"], p["b_tr"] = lin(ks[0], ks[1], repr_dim, feature_dim)
    p["ln_w"] = 1.0 + 0.1 * jax.random.normal(ks[2], (1, feature_dim), jnp.float32)
    p["ln_b"] = 0.1 * jax.random.normal(ks[3], (1, feature_dim), jnp.float32)
    idx = 4
    for name in ("q1", "q2"):
        w1, b1 = lin(ks[idx], ks[idx + 1], feature_dim + action_dim, hidden_dim)
        p[f"{name}_w1h"] = w1[:feature_dim]
        p[f"{name}_w1a"] = w1[feature_dim:]
        p[f"{name}_b1"] = b1
        p[f"{name}_w2"], p[f"{name}_b2"] = lin(ks[idx + 2], ks[idx + 3],
                                               hidden_dim, hidden_dim)
        p[f"{name}_w3"], p[f"{name}_b3"] = lin(ks[idx + 4], ks[idx + 5],
                                               hidden_dim, 1)
        idx += 6
    return p


def pack_params(p, matmul_dtype=jnp.float32):
    """One-time repack: fuse Q1/Q2 and (optionally) pre-cast the large matmul
    weights to matmul_dtype (e.g. bf16) on the host."""
    hidden_dim = p["q1_w2"].shape[0]
    packed = {
        "w_tr": p["w_tr"].astype(matmul_dtype),
        "b_tr": p["b_tr"], "ln_w": p["ln_w"], "ln_b": p["ln_b"],
        # layer 1: concat heads along the output dim -> one [feat, 2H] matmul
        "w1h": jnp.concatenate([p["q1_w1h"], p["q2_w1h"]], axis=1).astype(matmul_dtype),
        "w1a": jnp.concatenate([p["q1_w1a"], p["q2_w1a"]], axis=1),
        "b1": jnp.concatenate([p["q1_b1"], p["q2_b1"]], axis=1),
        # layer 2: stacked [2,H,H] -> two dense [H,H] matmuls, no zero padding
        "w2": jnp.stack([p["q1_w2"], p["q2_w2"]], axis=0).astype(matmul_dtype),
        "b2": jnp.concatenate([p["q1_b2"], p["q2_b2"]], axis=1),
        # layer 3: per-head weight rows -> VPU multiply + lane reduce
        "w3": jnp.stack([p["q1_w3"][:, 0], p["q2_w3"][:, 0]], axis=0),
    }
    b3 = jnp.zeros((1, _OUT_PAD), jnp.float32)
    b3 = b3.at[0, 0].set(p["q1_b3"][0, 0]).at[0, 1].set(p["q2_b3"][0, 0])
    packed["b3"] = b3
    return packed


def critic_reference(obs, action, params):
    """Plain-JAX reference of the PyTorch forward, for correctness checks."""
    x = obs @ params["w_tr"] + params["b_tr"]
    mean = jnp.mean(x, axis=-1, keepdims=True)
    var = jnp.mean((x - mean) ** 2, axis=-1, keepdims=True)
    h = jnp.tanh((x - mean) / jnp.sqrt(var + 1e-5) * params["ln_w"] + params["ln_b"])
    ha = jnp.concatenate([h, action], axis=-1)

    def q(name):
        w1 = jnp.concatenate([params[f"{name}_w1h"], params[f"{name}_w1a"]], axis=0)
        z = jnp.maximum(ha @ w1 + params[f"{name}_b1"], 0.0)
        z = jnp.maximum(z @ params[f"{name}_w2"] + params[f"{name}_b2"], 0.0)
        return z @ params[f"{name}_w3"] + params[f"{name}_b3"]

    return q("q1"), q("q2")


if __name__ == "__main__":
    def run(obs, action, packed, **kw):
        # If this JAX build rejects pipeline_mode=pl.Buffered(1) at lowering
        # time, retry with default double-buffered constant blocks.
        try:
            q1, q2 = critic_forward(obs, action, packed, **kw)
            jax.block_until_ready((q1, q2))
            return q1, q2
        except Exception:
            if kw.get("single_buffer_consts", True):
                kw = dict(kw, single_buffer_consts=False)
                q1, q2 = critic_forward(obs, action, packed, **kw)
                jax.block_until_ready((q1, q2))
                return q1, q2
            raise

    key = jax.random.PRNGKey(0)
    ka0, ka1, ka2, kb0, kb1, kb2 = jax.random.split(key, 6)

    # ---- config A: small aligned shapes, single K tile ----------------------
    B, R, A, F, H = 8, 64, 4, 32, 32
    obs = jax.random.normal(ka0, (B, R), jnp.float32)
    action = jax.random.uniform(ka1, (B, A), jnp.float32, minval=-1.0, maxval=1.0)
    params = init_params(ka2, R, A, F, H)
    packed = pack_params(params)

    q1, q2 = run(obs, action, packed)
    q1_ref, q2_ref = critic_reference(obs, action, params)
    assert q1.shape == (B, 1) and q2.shape == (B, 1)
    assert jnp.allclose(q1, q1_ref, atol=5e-3, rtol=5e-3), "config A q1 mismatch"
    assert jnp.allclose(q2, q2_ref, atol=5e-3, rtol=5e-3), "config A q2 mismatch"

    # ---- config A, bf16 weight/obs streaming path (v6e/v7x MXU native) ------
    packed_bf16 = pack_params(params, matmul_dtype=jnp.bfloat16)
    q1b, q2b = run(obs, action, packed_bf16, obs_dtype=jnp.bfloat16)
    assert jnp.allclose(q1b, q1_ref, atol=2e-1, rtol=2e-1), "bf16 q1 mismatch"
    assert jnp.allclose(q2b, q2_ref, atol=2e-1, rtol=2e-1), "bf16 q2 mismatch"

    # ---- config B: ragged batch / ragged K / multi-tile grid ----------------
    B, R, A, F, H = 20, 200, 5, 48, 32
    obs = jax.random.normal(kb0, (B, R), jnp.float32)
    action = jax.random.uniform(kb1, (B, A), jnp.float32, minval=-1.0, maxval=1.0)
    params = init_params(kb2, R, A, F, H)
    packed = pack_params(params)

    q1, q2 = run(obs, action, packed, batch_tile=8, k_tile=128)
    q1_ref, q2_ref = critic_reference(obs, action, params)
    assert q1.shape == (B, 1) and q2.shape == (B, 1)
    assert jnp.allclose(q1, q1_ref, atol=5e-3, rtol=5e-3), "config B q1 mismatch"
    assert jnp.allclose(q2, q2_ref, atol=5e-3, rtol=5e-3), "config B q2 mismatch"

    print("KERNEL_OK")
</pallas_src>

<mosaic_0001>
module attributes {stable_mosaic.version = 11 : i64} {
  func.func @_critic_kernel(%arg0: i32, %arg1: i32, %arg2: memref<8x64xf32, #tpu.memory_space<vmem>>, %arg3: memref<8x4xf32, #tpu.memory_space<vmem>>, %arg4: memref<64x32xf32, #tpu.memory_space<vmem>>, %arg5: memref<1x32xf32, #tpu.memory_space<vmem>>, %arg6: memref<1x32xf32, #tpu.memory_space<vmem>>, %arg7: memref<1x32xf32, #tpu.memory_space<vmem>>, %arg8: memref<32x64xf32, #tpu.memory_space<vmem>>, %arg9: memref<4x64xf32, #tpu.memory_space<vmem>>, %arg10: memref<1x64xf32, #tpu.memory_space<vmem>>, %arg11: memref<2x32x32xf32, #tpu.memory_space<vmem>>, %arg12: memref<1x64xf32, #tpu.memory_space<vmem>>, %arg13: memref<2x32xf32, #tpu.memory_space<vmem>>, %arg14: memref<1x128xf32, #tpu.memory_space<vmem>>, %arg15: memref<8x128xf32, #tpu.memory_space<vmem>>, %arg16: memref<8x32xf32, #tpu.memory_space<vmem>>) attributes {dimension_semantics = [#tpu.dimension_semantics<parallel>, #tpu.dimension_semantics<arbitrary>], iteration_bounds = array<i64: 1, 1>, scalar_prefetch = 0 : i64, scratch_operands = 1 : i64, tpu.core_type = #tpu.core_type<tc>, window_params = [{transform_indices = @transform_0, window_bounds = array<i64: 8, 64>}, {transform_indices = @transform_1, window_bounds = array<i64: 8, 4>}, {transform_indices = @transform_2, window_bounds = array<i64: 64, 32>}, {pipeline_mode = #tpu.pipeline_mode<synchronous>, transform_indices = @transform_3, window_bounds = array<i64: 1, 32>}, {pipeline_mode = #tpu.pipeline_mode<synchronous>, transform_indices = @transform_4, window_bounds = array<i64: 1, 32>}, {pipeline_mode = #tpu.pipeline_mode<synchronous>, transform_indices = @transform_5, window_bounds = array<i64: 1, 32>}, {pipeline_mode = #tpu.pipeline_mode<synchronous>, transform_indices = @transform_6, window_bounds = array<i64: 32, 64>}, {pipeline_mode = #tpu.pipeline_mode<synchronous>, transform_indices = @transform_7, window_bounds = array<i64: 4, 64>}, {pipeline_mode = #tpu.pipeline_mode<synchronous>, transform_indices = @transform_8, window_bounds = array<i64: 1, 64>}, {pipeline_mode = #tpu.pipeline_mode<synchronous>, transform_indices = @transform_9, window_bounds = array<i64: 2, 32, 32>}, {pipeline_mode = #tpu.pipeline_mode<synchronous>, transform_indices = @transform_10, window_bounds = array<i64: 1, 64>}, {pipeline_mode = #tpu.pipeline_mode<synchronous>, transform_indices = @transform_11, window_bounds = array<i64: 2, 32>}, {pipeline_mode = #tpu.pipeline_mode<synchronous>, transform_indices = @transform_12, window_bounds = array<i64: 1, 128>}, {transform_indices = @transform_13, window_bounds = array<i64: 8, 128>}]} {
    %c0_i32 = arith.constant 0 : i32
    %0 = arith.cmpi eq, %arg1, %c0_i32 : i32
    %1 = arith.extui %0 : i1 to i32
    %c0_i32_0 = arith.constant 0 : i32
    %2 = arith.cmpi ne, %1, %c0_i32_0 : i32
    scf.if %2 {
      %cst_10 = arith.constant 0.000000e+00 : f32
      %12 = vector.broadcast %cst_10 : f32 to vector<8x32xf32>
      %c0_11 = arith.constant 0 : index
      %c0_12 = arith.constant 0 : index
      %13 = vector.load %arg16[%c0_11, %c0_12] : memref<8x32xf32, #tpu.memory_space<vmem>>, vector<8x32xf32>
      tpu.vector_store %arg16[%c0_11, %c0_12], %12 {strides = array<i32>} : memref<8x32xf32, #tpu.memory_space<vmem>>, vector<8x32xf32>,
    } else {
    }
    %c0 = arith.constant 0 : index
    %c0_1 = arith.constant 0 : index
    %3 = vector.load %arg2[%c0, %c0_1] : memref<8x64xf32, #tpu.memory_space<vmem>>, vector<8x64xf32>
    %c0_2 = arith.constant 0 : index
    %c0_3 = arith.constant 0 : index
    %4 = vector.load %arg4[%c0_2, %c0_3] : memref<64x32xf32, #tpu.memory_space<vmem>>, vector<64x32xf32>
    %c0_4 = arith.constant 0 : index
    %c0_5 = arith.constant 0 : index
    %5 = vector.load %arg16[%c0_4, %c0_5] : memref<8x32xf32, #tpu.memory_space<vmem>>, vector<8x32xf32>
    %cst = arith.constant dense<0.000000e+00> : vector<8x32xf32>
    %6 = tpu.matmul %3, %4, %cst {dimension_numbers = #tpu.dot_dimension_numbers<[1], [0], [0], [1], [0, 0, 1, 1], [], []>} : vector<8x64xf32>, vector<64x32xf32>, vector<8x32xf32> -> vector<8x32xf32>
    %7 = arith.addf %5, %6 : vector<8x32xf32>
    %c0_6 = arith.constant 0 : index
    %c0_7 = arith.constant 0 : index
    %8 = vector.load %arg16[%c0_6, %c0_7] : memref<8x32xf32, #tpu.memory_space<vmem>>, vector<8x32xf32>
    tpu.vector_store %arg16[%c0_6, %c0_7], %7 {strides = array<i32>} : memref<8x32xf32, #tpu.memory_space<vmem>>, vector<8x32xf32>,
    %c0_i32_8 = arith.constant 0 : i32
    %9 = arith.cmpi eq, %arg1, %c0_i32_8 : i32
    %10 = arith.extui %9 : i1 to i32
    %c0_i32_9 = arith.constant 0 : i32
    %11 = arith.cmpi ne, %10, %c0_i32_9 : i32
    scf.if %11 {
      %c0_10 = arith.constant 0 : index
      %c0_11 = arith.constant 0 : index
      %12 = vector.load %arg16[%c0_10, %c0_11] : memref<8x32xf32, #tpu.memory_space<vmem>>, vector<8x32xf32>
      %c0_12 = arith.constant 0 : index
      %c0_13 = arith.constant 0 : index
      %13 = vector.load %arg5[%c0_12, %c0_13] : memref<1x32xf32, #tpu.memory_space<vmem>>, vector<1x32xf32>
      %14 = vector.broadcast %13 : vector<1x32xf32> to vector<8x32xf32>
      %15 = arith.addf %12, %14 : vector<8x32xf32>
      %cst_14 = arith.constant dense<0.000000e+00> : vector<8xf32>
      %16 = vector.multi_reduction <add>, %15, %cst_14 [1] : vector<8x32xf32> to vector<8xf32>
      %17 = vector.shape_cast %16 : vector<8xf32> to vector<8x1xf32>
      %cst_15 = arith.constant 3.200000e+01 : f32
      %18 = vector.broadcast %cst_15 : f32 to vector<8x1xf32>
      %19 = arith.divf %17, %18 : vector<8x1xf32>
      %20 = vector.broadcast %19 : vector<8x1xf32> to vector<8x32xf32>
      %21 = arith.subf %15, %20 : vector<8x32xf32>
      %22 = arith.mulf %21, %21 : vector<8x32xf32>
      %cst_16 = arith.constant dense<0.000000e+00> : vector<8xf32>
      %23 = vector.multi_reduction <add>, %22, %cst_16 [1] : vector<8x32xf32> to vector<8xf32>
      %24 = vector.shape_cast %23 : vector<8xf32> to vector<8x1xf32>
      %cst_17 = arith.constant 3.200000e+01 : f32
      %25 = vector.broadcast %cst_17 : f32 to vector<8x1xf32>
      %26 = arith.divf %24, %25 : vector<8x1xf32>
      %cst_18 = arith.constant 9.99999974E-6 : f32
      %27 = vector.broadcast %cst_18 : f32 to vector<8x1xf32>
      %28 = arith.addf %26, %27 : vector<8x1xf32>
      %29 = math.rsqrt %28 : vector<8x1xf32>
      %30 = vector.broadcast %29 : vector<8x1xf32> to vector<8x32xf32>
      %31 = arith.mulf %21, %30 : vector<8x32xf32>
      %c0_19 = arith.constant 0 : index
      %c0_20 = arith.constant 0 : index
      %32 = vector.load %arg6[%c0_19, %c0_20] : memref<1x32xf32, #tpu.memory_space<vmem>>, vector<1x32xf32>
      %33 = vector.broadcast %32 : vector<1x32xf32> to vector<8x32xf32>
      %34 = arith.mulf %31, %33 : vector<8x32xf32>
      %c0_21 = arith.constant 0 : index
      %c0_22 = arith.constant 0 : index
      %35 = vector.load %arg7[%c0_21, %c0_22] : memref<1x32xf32, #tpu.memory_space<vmem>>, vector<1x32xf32>
      %36 = vector.broadcast %35 : vector<1x32xf32> to vector<8x32xf32>
      %37 = arith.addf %34, %36 : vector<8x32xf32>
      %38 = math.tanh %37 : vector<8x32xf32>
      %c0_23 = arith.constant 0 : index
      %c0_24 = arith.constant 0 : index
      %39 = vector.load %arg8[%c0_23, %c0_24] : memref<32x64xf32, #tpu.memory_space<vmem>>, vector<32x64xf32>
      %cst_25 = arith.constant dense<0.000000e+00> : vector<8x64xf32>
      %40 = tpu.matmul %38, %39, %cst_25 {dimension_numbers = #tpu.dot_dimension_numbers<[1], [0], [0], [1], [0, 0, 1, 1], [], []>} : vector<8x32xf32>, vector<32x64xf32>, vector<8x64xf32> -> vector<8x64xf32>
      %c0_26 = arith.constant 0 : index
      %c0_27 = arith.constant 0 : index
      %41 = vector.load %arg10[%c0_26, %c0_27] : memref<1x64xf32, #tpu.memory_space<vmem>>, vector<1x64xf32>
      %42 = vector.broadcast %41 : vector<1x64xf32> to vector<8x64xf32>
      %43 = arith.addf %40, %42 : vector<8x64xf32>
      %c0_28 = arith.constant 0 : index
      %c0_29 = arith.constant 0 : index
      %44 = vector.load %arg3[%c0_28, %c0_29] : memref<8x4xf32, #tpu.memory_space<vmem>>, vector<8x4xf32>
      %c0_30 = arith.constant 0 : index
      %c0_31 = arith.constant 0 : index
      %45 = vector.load %arg9[%c0_30, %c0_31] : memref<4x64xf32, #tpu.memory_space<vmem>>, vector<4x64xf32>
      %46 = vector.extract_strided_slice %44 {offsets = [0, 0], sizes = [8, 1], strides = [1, 1]} : vector<8x4xf32> to vector<8x1xf32>
      %47 = vector.extract_strided_slice %45 {offsets = [0, 0], sizes = [1, 64], strides = [1, 1]} : vector<4x64xf32> to vector<1x64xf32>
      %48 = vector.broadcast %46 : vector<8x1xf32> to vector<8x64xf32>
      %49 = vector.broadcast %47 : vector<1x64xf32> to vector<8x64xf32>
      %50 = arith.mulf %48, %49 : vector<8x64xf32>
      %51 = arith.addf %43, %50 : vector<8x64xf32>
      %52 = vector.extract_strided_slice %44 {offsets = [0, 1], sizes = [8, 1], strides = [1, 1]} : vector<8x4xf32> to vector<8x1xf32>
      %53 = vector.extract_strided_slice %45 {offsets = [1, 0], sizes = [1, 64], strides = [1, 1]} : vector<4x64xf32> to vector<1x64xf32>
      %54 = vector.broadcast %52 : vector<8x1xf32> to vector<8x64xf32>
      %55 = vector.broadcast %53 : vector<1x64xf32> to vector<8x64xf32>
      %56 = arith.mulf %54, %55 : vector<8x64xf32>
      %57 = arith.addf %51, %56 : vector<8x64xf32>
      %58 = vector.extract_strided_slice %44 {offsets = [0, 2], sizes = [8, 1], strides = [1, 1]} : vector<8x4xf32> to vector<8x1xf32>
      %59 = vector.extract_strided_slice %45 {offsets = [2, 0], sizes = [1, 64], strides = [1, 1]} : vector<4x64xf32> to vector<1x64xf32>
      %60 = vector.broadcast %58 : vector<8x1xf32> to vector<8x64xf32>
      %61 = vector.broadcast %59 : vector<1x64xf32> to vector<8x64xf32>
      %62 = arith.mulf %60, %61 : vector<8x64xf32>
      %63 = arith.addf %57, %62 : vector<8x64xf32>
      %64 = vector.extract_strided_slice %44 {offsets = [0, 3], sizes = [8, 1], strides = [1, 1]} : vector<8x4xf32> to vector<8x1xf32>
      %65 = vector.extract_strided_slice %45 {offsets = [3, 0], sizes = [1, 64], strides = [1, 1]} : vector<4x64xf32> to vector<1x64xf32>
      %66 = vector.broadcast %64 : vector<8x1xf32> to vector<8x64xf32>
      %67 = vector.broadcast %65 : vector<1x64xf32> to vector<8x64xf32>
      %68 = arith.mulf %66, %67 : vector<8x64xf32>
      %69 = arith.addf %63, %68 : vector<8x64xf32>
      %cst_32 = arith.constant 0.000000e+00 : f32
      %70 = vector.broadcast %cst_32 : f32 to vector<8x64xf32>
      %71 = arith.maximumf %69, %70 : vector<8x64xf32>
      %c0_33 = arith.constant 0 : index
      %c0_34 = arith.constant 0 : index
      %72 = vector.load %arg12[%c0_33, %c0_34] : memref<1x64xf32, #tpu.memory_space<vmem>>, vector<1x64xf32>
      %73 = vector.extract_strided_slice %71 {offsets = [0, 0], sizes = [8, 32], strides = [1, 1]} : vector<8x64xf32> to vector<8x32xf32>
      %c0_35 = arith.constant 0 : index
      %c0_36 = arith.constant 0 : index
      %c0_37 = arith.constant 0 : index
      %74 = vector.load %arg11[%c0_35, %c0_36, %c0_37] : memref<2x32x32xf32, #tpu.memory_space<vmem>>, vector<1x32x32xf32>
      %75 = vector.shape_cast %74 : vector<1x32x32xf32> to vector<32x32xf32>
      %cst_38 = arith.constant dense<0.000000e+00> : vector<8x32xf32>
      %76 = tpu.matmul %73, %75, %cst_38 {dimension_numbers = #tpu.dot_dimension_numbers<[1], [0], [0], [1], [0, 0, 1, 1], [], []>} : vector<8x32xf32>, vector<32x32xf32>, vector<8x32xf32> -> vector<8x32xf32>
      %77 = vector.extract_strided_slice %72 {offsets = [0, 0], sizes = [1, 32], strides = [1, 1]} : vector<1x64xf32> to vector<1x32xf32>
      %78 = vector.broadcast %77 : vector<1x32xf32> to vector<8x32xf32>
      %79 = arith.addf %76, %78 : vector<8x32xf32>
      %80 = vector.extract_strided_slice %71 {offsets = [0, 32], sizes = [8, 32], strides = [1, 1]} : vector<8x64xf32> to vector<8x32xf32>
      %c1 = arith.constant 1 : index
      %c0_39 = arith.constant 0 : index
      %c0_40 = arith.constant 0 : index
      %81 = vector.load %arg11[%c1, %c0_39, %c0_40] : memref<2x32x32xf32, #tpu.memory_space<vmem>>, vector<1x32x32xf32>
      %82 = vector.shape_cast %81 : vector<1x32x32xf32> to vector<32x32xf32>
      %cst_41 = arith.constant dense<0.000000e+00> : vector<8x32xf32>
      %83 = tpu.matmul %80, %82, %cst_41 {dimension_numbers = #tpu.dot_dimension_numbers<[1], [0], [0], [1], [0, 0, 1, 1], [], []>} : vector<8x32xf32>, vector<32x32xf32>, vector<8x32xf32> -> vector<8x32xf32>
      %84 = vector.extract_strided_slice %72 {offsets = [0, 32], sizes = [1, 32], strides = [1, 1]} : vector<1x64xf32> to vector<1x32xf32>
      %85 = vector.broadcast %84 : vector<1x32xf32> to vector<8x32xf32>
      %86 = arith.addf %83, %85 : vector<8x32xf32>
      %cst_42 = arith.constant 0.000000e+00 : f32
      %87 = vector.broadcast %cst_42 : f32 to vector<8x32xf32>
      %88 = arith.maximumf %79, %87 : vector<8x32xf32>
      %cst_43 = arith.constant 0.000000e+00 : f32
      %89 = vector.broadcast %cst_43 : f32 to vector<8x32xf32>
      %90 = arith.maximumf %86, %89 : vector<8x32xf32>
      %c0_44 = arith.constant 0 : index
      %c0_45 = arith.constant 0 : index
      %91 = vector.load %arg13[%c0_44, %c0_45] : memref<2x32xf32, #tpu.memory_space<vmem>>, vector<2x32xf32>
      %92 = vector.extract_strided_slice %91 {offsets = [0, 0], sizes = [1, 32], strides = [1, 1]} : vector<2x32xf32> to vector<1x32xf32>
      %93 = vector.broadcast %92 : vector<1x32xf32> to vector<8x32xf32>
      %94 = arith.mulf %88, %93 : vector<8x32xf32>
      %cst_46 = arith.constant dense<0.000000e+00> : vector<8xf32>
      %95 = vector.multi_reduction <add>, %94, %cst_46 [1] : vector<8x32xf32> to vector<8xf32>
      %96 = vector.shape_cast %95 : vector<8xf32> to vector<8x1xf32>
      %97 = vector.extract_strided_slice %91 {offsets = [1, 0], sizes = [1, 32], strides = [1, 1]} : vector<2x32xf32> to vector<1x32xf32>
      %98 = vector.broadcast %97 : vector<1x32xf32> to vector<8x32xf32>
      %99 = arith.mulf %90, %98 : vector<8x32xf32>
      %cst_47 = arith.constant dense<0.000000e+00> : vector<8xf32>
      %100 = vector.multi_reduction <add>, %99, %cst_47 [1] : vector<8x32xf32> to vector<8xf32>
      %101 = vector.shape_cast %100 : vector<8xf32> to vector<8x1xf32>
      %102 = tpu.iota {dimensions = array<i32: 1>} : vector<8x128xi32>
      %c0_i32_48 = arith.constant 0 : i32
      %103 = vector.broadcast %c0_i32_48 : i32 to vector<8x128xi32>
      %104 = arith.cmpi eq, %102, %103 : vector<8x128xi32>
      %c1_i32 = arith.constant 1 : i32
      %105 = vector.broadcast %c1_i32 : i32 to vector<8x128xi32>
      %106 = arith.cmpi eq, %102, %105 : vector<8x128xi32>
      %cst_49 = arith.constant 0.000000e+00 : f32
      %107 = vector.shape_cast %101 : vector<8x1xf32> to vector<8x1xf32>
      %108 = vector.broadcast %107 : vector<8x1xf32> to vector<8x128xf32>
      %109 = vector.broadcast %cst_49 : f32 to vector<8x128xf32>
      %110 = arith.select %106, %108, %109 : vector<8x128xi1>, vector<8x128xf32>
      %111 = vector.shape_cast %96 : vector<8x1xf32> to vector<8x1xf32>
      %112 = vector.broadcast %111 : vector<8x1xf32> to vector<8x128xf32>
      %113 = arith.select %104, %112, %110 : vector<8x128xi1>, vector<8x128xf32>
      %c0_50 = arith.constant 0 : index
      %c0_51 = arith.constant 0 : index
      %114 = vector.load %arg14[%c0_50, %c0_51] : memref<1x128xf32, #tpu.memory_space<vmem>>, vector<1x128xf32>
      %115 = vector.broadcast %114 : vector<1x128xf32> to vector<8x128xf32>
      %116 = arith.addf %113, %115 : vector<8x128xf32>
      %c0_52 = arith.constant 0 : index
      %c0_53 = arith.constant 0 : index
      %117 = vector.load %arg15[%c0_52, %c0_53] : memref<8x128xf32, #tpu.memory_space<vmem>>, vector<8x128xf32>
      tpu.vector_store %arg15[%c0_52, %c0_53], %116 {strides = array<i32>} : memref<8x128xf32, #tpu.memory_space<vmem>>, vector<8x128xf32>,
    } else {
    }
    return
  }
  func.func @transform_0(%arg0: i32, %arg1: i32) -> (i32, i32) {
    %c0_i32 = arith.constant 0 : i32
    return %arg0, %arg1 : i32, i32
  }
  func.func @transform_1(%arg0: i32, %arg1: i32) -> (i32, i32) {
    %c0_i32 = arith.constant 0 : i32
    %c0_i32_0 = arith.constant 0 : i32
    return %arg0, %c0_i32 : i32, i32
  }
  func.func @transform_2(%arg0: i32, %arg1: i32) -> (i32, i32) {
    %c0_i32 = arith.constant 0 : i32
    %c0_i32_0 = arith.constant 0 : i32
    return %arg1, %c0_i32 : i32, i32
  }
  func.func @transform_3(%arg0: i32, %arg1: i32) -> (i32, i32) {
    %c0_i32 = arith.constant 0 : i32
    %c0_i32_0 = arith.constant 0 : i32
    %c0_i32_1 = arith.constant 0 : i32
    return %c0_i32, %c0_i32_0 : i32, i32
  }
  func.func @transform_4(%arg0: i32, %arg1: i32) -> (i32, i32) {
    %c0_i32 = arith.constant 0 : i32
    %c0_i32_0 = arith.constant 0 : i32
    %c0_i32_1 = arith.constant 0 : i32
    return %c0_i32, %c0_i32_0 : i32, i32
  }
  func.func @transform_5(%arg0: i32, %arg1: i32) -> (i32, i32) {
    %c0_i32 = arith.constant 0 : i32
    %c0_i32_0 = arith.constant 0 : i32
    %c0_i32_1 = arith.constant 0 : i32
    return %c0_i32, %c0_i32_0 : i32, i32
  }
  func.func @transform_6(%arg0: i32, %arg1: i32) -> (i32, i32) {
    %c0_i32 = arith.constant 0 : i32
    %c0_i32_0 = arith.constant 0 : i32
    %c0_i32_1 = arith.constant 0 : i32
    return %c0_i32, %c0_i32_0 : i32, i32
  }
  func.func @transform_7(%arg0: i32, %arg1: i32) -> (i32, i32) {
    %c0_i32 = arith.constant 0 : i32
    %c0_i32_0 = arith.constant 0 : i32
    %c0_i32_1 = arith.constant 0 : i32
    return %c0_i32, %c0_i32_0 : i32, i32
  }
  func.func @transform_8(%arg0: i32, %arg1: i32) -> (i32, i32) {
    %c0_i32 = arith.constant 0 : i32
    %c0_i32_0 = arith.constant 0 : i32
    %c0_i32_1 = arith.constant 0 : i32
    return %c0_i32, %c0_i32_0 : i32, i32
  }
  func.func @transform_9(%arg0: i32, %arg1: i32) -> (i32, i32, i32) {
    %c0_i32 = arith.constant 0 : i32
    %c0_i32_0 = arith.constant 0 : i32
    %c0_i32_1 = arith.constant 0 : i32
    %c0_i32_2 = arith.constant 0 : i32
    return %c0_i32, %c0_i32_0, %c0_i32_1 : i32, i32, i32
  }
  func.func @transform_10(%arg0: i32, %arg1: i32) -> (i32, i32) {
    %c0_i32 = arith.constant 0 : i32
    %c0_i32_0 = arith.constant 0 : i32
    %c0_i32_1 = arith.constant 0 : i32
    return %c0_i32, %c0_i32_0 : i32, i32
  }
  func.func @transform_11(%arg0: i32, %arg1: i32) -> (i32, i32) {
    %c0_i32 = arith.constant 0 : i32
    %c0_i32_0 = arith.constant 0 : i32
    %c0_i32_1 = arith.constant 0 : i32
    return %c0_i32, %c0_i32_0 : i32, i32
  }
  func.func @transform_12(%arg0: i32, %arg1: i32) -> (i32, i32) {
    %c0_i32 = arith.constant 0 : i32
    %c0_i32_0 = arith.constant 0 : i32
    %c0_i32_1 = arith.constant 0 : i32
    return %c0_i32, %c0_i32_0 : i32, i32
  }
  func.func @transform_13(%arg0: i32, %arg1: i32) -> (i32, i32) {
    %c0_i32 = arith.constant 0 : i32
    %c0_i32_0 = arith.constant 0 : i32
    return %arg0, %c0_i32 : i32, i32
  }
}

module attributes {stable_mosaic.version = 11 : i64} {
  func.func @_critic_kernel(%arg0: i32, %arg1: i32, %arg2: memref<8x64xf32, #tpu.memory_space<vmem>>, %arg3: memref<8x4xf32, #tpu.memory_space<vmem>>, %arg4: memref<64x32xf32, #tpu.memory_space<vmem>>, %arg5: memref<1x32xf32, #tpu.memory_space<vmem>>, %arg6: memref<1x32xf32, #tpu.memory_space<vmem>>, %arg7: memref<1x32xf32, #tpu.memory_space<vmem>>, %arg8: memref<32x64xf32, #tpu.memory_space<vmem>>, %arg9: memref<4x64xf32, #tpu.memory_space<vmem>>, %arg10: memref<1x64xf32, #tpu.memory_space<vmem>>, %arg11: memref<2x32x32xf32, #tpu.memory_space<vmem>>, %arg12: memref<1x64xf32, #tpu.memory_space<vmem>>, %arg13: memref<2x32xf32, #tpu.memory_space<vmem>>, %arg14: memref<1x128xf32, #tpu.memory_space<vmem>>, %arg15: memref<8x128xf32, #tpu.memory_space<vmem>>, %arg16: memref<8x32xf32, #tpu.memory_space<vmem>>) attributes {dimension_semantics = [#tpu.dimension_semantics<parallel>, #tpu.dimension_semantics<arbitrary>], iteration_bounds = array<i64: 1, 1>, scalar_prefetch = 0 : i64, scratch_operands = 1 : i64, tpu.core_type = #tpu.core_type<tc>, window_params = [{transform_indices = @transform_0, window_bounds = array<i64: 8, 64>}, {transform_indices = @transform_1, window_bounds = array<i64: 8, 4>}, {transform_indices = @transform_2, window_bounds = array<i64: 64, 32>}, {pipeline_mode = #tpu.pipeline_mode<synchronous>, transform_indices = @transform_3, window_bounds = array<i64: 1, 32>}, {pipeline_mode = #tpu.pipeline_mode<synchronous>, transform_indices = @transform_4, window_bounds = array<i64: 1, 32>}, {pipeline_mode = #tpu.pipeline_mode<synchronous>, transform_indices = @transform_5, window_bounds = array<i64: 1, 32>}, {pipeline_mode = #tpu.pipeline_mode<synchronous>, transform_indices = @transform_6, window_bounds = array<i64: 32, 64>}, {pipeline_mode = #tpu.pipeline_mode<synchronous>, transform_indices = @transform_7, window_bounds = array<i64: 4, 64>}, {pipeline_mode = #tpu.pipeline_mode<synchronous>, transform_indices = @transform_8, window_bounds = array<i64: 1, 64>}, {pipeline_mode = #tpu.pipeline_mode<synchronous>, transform_indices = @transform_9, window_bounds = array<i64: 2, 32, 32>}, {pipeline_mode = #tpu.pipeline_mode<synchronous>, transform_indices = @transform_10, window_bounds = array<i64: 1, 64>}, {pipeline_mode = #tpu.pipeline_mode<synchronous>, transform_indices = @transform_11, window_bounds = array<i64: 2, 32>}, {pipeline_mode = #tpu.pipeline_mode<synchronous>, transform_indices = @transform_12, window_bounds = array<i64: 1, 128>}, {transform_indices = @transform_13, window_bounds = array<i64: 8, 128>}]} {
    %c0_i32 = arith.constant 0 : i32
    %0 = arith.cmpi eq, %arg1, %c0_i32 : i32
    %1 = arith.extui %0 : i1 to i32
    %c0_i32_0 = arith.constant 0 : i32
    %2 = arith.cmpi ne, %1, %c0_i32_0 : i32
    scf.if %2 {
      %cst_10 = arith.constant 0.000000e+00 : f32
      %12 = vector.broadcast %cst_10 : f32 to vector<8x32xf32>
      %c0_11 = arith.constant 0 : index
      %c0_12 = arith.constant 0 : index
      %13 = vector.load %arg16[%c0_11, %c0_12] : memref<8x32xf32, #tpu.memory_space<vmem>>, vector<8x32xf32>
      tpu.vector_store %arg16[%c0_11, %c0_12], %12 {strides = array<i32>} : memref<8x32xf32, #tpu.memory_space<vmem>>, vector<8x32xf32>,
    } else {
    }
    %c0 = arith.constant 0 : index
    %c0_1 = arith.constant 0 : index
    %3 = vector.load %arg2[%c0, %c0_1] : memref<8x64xf32, #tpu.memory_space<vmem>>, vector<8x64xf32>
    %c0_2 = arith.constant 0 : index
    %c0_3 = arith.constant 0 : index
    %4 = vector.load %arg4[%c0_2, %c0_3] : memref<64x32xf32, #tpu.memory_space<vmem>>, vector<64x32xf32>
    %c0_4 = arith.constant 0 : index
    %c0_5 = arith.constant 0 : index
    %5 = vector.load %arg16[%c0_4, %c0_5] : memref<8x32xf32, #tpu.memory_space<vmem>>, vector<8x32xf32>
    %cst = arith.constant dense<0.000000e+00> : vector<8x32xf32>
    %6 = tpu.matmul %3, %4, %cst {dimension_numbers = #tpu.dot_dimension_numbers<[1], [0], [0], [1], [0, 0, 1, 1], [], []>} : vector<8x64xf32>, vector<64x32xf32>, vector<8x32xf32> -> vector<8x32xf32>
    %7 = arith.addf %5, %6 : vector<8x32xf32>
    %c0_6 = arith.constant 0 : index
    %c0_7 = arith.constant 0 : index
    %8 = vector.load %arg16[%c0_6, %c0_7] : memref<8x32xf32, #tpu.memory_space<vmem>>, vector<8x32xf32>
    tpu.vector_store %arg16[%c0_6, %c0_7], %7 {strides = array<i32>} : memref<8x32xf32, #tpu.memory_space<vmem>>, vector<8x32xf32>,
    %c0_i32_8 = arith.constant 0 : i32
    %9 = arith.cmpi eq, %arg1, %c0_i32_8 : i32
    %10 = arith.extui %9 : i1 to i32
    %c0_i32_9 = arith.constant 0 : i32
    %11 = arith.cmpi ne, %10, %c0_i32_9 : i32
    scf.if %11 {
      %c0_10 = arith.constant 0 : index
      %c0_11 = arith.constant 0 : index
      %12 = vector.load %arg16[%c0_10, %c0_11] : memref<8x32xf32, #tpu.memory_space<vmem>>, vector<8x32xf32>
      %c0_12 = arith.constant 0 : index
      %c0_13 = arith.constant 0 : index
      %13 = vector.load %arg5[%c0_12, %c0_13] : memref<1x32xf32, #tpu.memory_space<vmem>>, vector<1x32xf32>
      %14 = vector.broadcast %13 : vector<1x32xf32> to vector<8x32xf32>
      %15 = arith.addf %12, %14 : vector<8x32xf32>
      %cst_14 = arith.constant dense<0.000000e+00> : vector<8xf32>
      %16 = vector.multi_reduction <add>, %15, %cst_14 [1] : vector<8x32xf32> to vector<8xf32>
      %17 = vector.shape_cast %16 : vector<8xf32> to vector<8x1xf32>
      %cst_15 = arith.constant 3.200000e+01 : f32
      %18 = vector.broadcast %cst_15 : f32 to vector<8x1xf32>
      %19 = arith.divf %17, %18 : vector<8x1xf32>
      %20 = vector.broadcast %19 : vector<8x1xf32> to vector<8x32xf32>
      %21 = arith.subf %15, %20 : vector<8x32xf32>
      %22 = arith.mulf %21, %21 : vector<8x32xf32>
      %cst_16 = arith.constant dense<0.000000e+00> : vector<8xf32>
      %23 = vector.multi_reduction <add>, %22, %cst_16 [1] : vector<8x32xf32> to vector<8xf32>
      %24 = vector.shape_cast %23 : vector<8xf32> to vector<8x1xf32>
      %cst_17 = arith.constant 3.200000e+01 : f32
      %25 = vector.broadcast %cst_17 : f32 to vector<8x1xf32>
      %26 = arith.divf %24, %25 : vector<8x1xf32>
      %cst_18 = arith.constant 9.99999974E-6 : f32
      %27 = vector.broadcast %cst_18 : f32 to vector<8x1xf32>
      %28 = arith.addf %26, %27 : vector<8x1xf32>
      %29 = math.rsqrt %28 : vector<8x1xf32>
      %30 = vector.broadcast %29 : vector<8x1xf32> to vector<8x32xf32>
      %31 = arith.mulf %21, %30 : vector<8x32xf32>
      %c0_19 = arith.constant 0 : index
      %c0_20 = arith.constant 0 : index
      %32 = vector.load %arg6[%c0_19, %c0_20] : memref<1x32xf32, #tpu.memory_space<vmem>>, vector<1x32xf32>
      %33 = vector.broadcast %32 : vector<1x32xf32> to vector<8x32xf32>
      %34 = arith.mulf %31, %33 : vector<8x32xf32>
      %c0_21 = arith.constant 0 : index
      %c0_22 = arith.constant 0 : index
      %35 = vector.load %arg7[%c0_21, %c0_22] : memref<1x32xf32, #tpu.memory_space<vmem>>, vector<1x32xf32>
      %36 = vector.broadcast %35 : vector<1x32xf32> to vector<8x32xf32>
      %37 = arith.addf %34, %36 : vector<8x32xf32>
      %38 = math.tanh %37 : vector<8x32xf32>
      %c0_23 = arith.constant 0 : index
      %c0_24 = arith.constant 0 : index
      %39 = vector.load %arg8[%c0_23, %c0_24] : memref<32x64xf32, #tpu.memory_space<vmem>>, vector<32x64xf32>
      %cst_25 = arith.constant dense<0.000000e+00> : vector<8x64xf32>
      %40 = tpu.matmul %38, %39, %cst_25 {dimension_numbers = #tpu.dot_dimension_numbers<[1], [0], [0], [1], [0, 0, 1, 1], [], []>} : vector<8x32xf32>, vector<32x64xf32>, vector<8x64xf32> -> vector<8x64xf32>
      %c0_26 = arith.constant 0 : index
      %c0_27 = arith.constant 0 : index
      %41 = vector.load %arg10[%c0_26, %c0_27] : memref<1x64xf32, #tpu.memory_space<vmem>>, vector<1x64xf32>
      %42 = vector.broadcast %41 : vector<1x64xf32> to vector<8x64xf32>
      %43 = arith.addf %40, %42 : vector<8x64xf32>
      %c0_28 = arith.constant 0 : index
      %c0_29 = arith.constant 0 : index
      %44 = vector.load %arg3[%c0_28, %c0_29] : memref<8x4xf32, #tpu.memory_space<vmem>>, vector<8x4xf32>
      %c0_30 = arith.constant 0 : index
      %c0_31 = arith.constant 0 : index
      %45 = vector.load %arg9[%c0_30, %c0_31] : memref<4x64xf32, #tpu.memory_space<vmem>>, vector<4x64xf32>
      %46 = vector.extract_strided_slice %44 {offsets = [0, 0], sizes = [8, 1], strides = [1, 1]} : vector<8x4xf32> to vector<8x1xf32>
      %47 = vector.extract_strided_slice %45 {offsets = [0, 0], sizes = [1, 64], strides = [1, 1]} : vector<4x64xf32> to vector<1x64xf32>
      %48 = vector.broadcast %46 : vector<8x1xf32> to vector<8x64xf32>
      %49 = vector.broadcast %47 : vector<1x64xf32> to vector<8x64xf32>
      %50 = arith.mulf %48, %49 : vector<8x64xf32>
      %51 = arith.addf %43, %50 : vector<8x64xf32>
      %52 = vector.extract_strided_slice %44 {offsets = [0, 1], sizes = [8, 1], strides = [1, 1]} : vector<8x4xf32> to vector<8x1xf32>
      %53 = vector.extract_strided_slice %45 {offsets = [1, 0], sizes = [1, 64], strides = [1, 1]} : vector<4x64xf32> to vector<1x64xf32>
      %54 = vector.broadcast %52 : vector<8x1xf32> to vector<8x64xf32>
      %55 = vector.broadcast %53 : vector<1x64xf32> to vector<8x64xf32>
      %56 = arith.mulf %54, %55 : vector<8x64xf32>
      %57 = arith.addf %51, %56 : vector<8x64xf32>
      %58 = vector.extract_strided_slice %44 {offsets = [0, 2], sizes = [8, 1], strides = [1, 1]} : vector<8x4xf32> to vector<8x1xf32>
      %59 = vector.extract_strided_slice %45 {offsets = [2, 0], sizes = [1, 64], strides = [1, 1]} : vector<4x64xf32> to vector<1x64xf32>
      %60 = vector.broadcast %58 : vector<8x1xf32> to vector<8x64xf32>
      %61 = vector.broadcast %59 : vector<1x64xf32> to vector<8x64xf32>
      %62 = arith.mulf %60, %61 : vector<8x64xf32>
      %63 = arith.addf %57, %62 : vector<8x64xf32>
      %64 = vector.extract_strided_slice %44 {offsets = [0, 3], sizes = [8, 1], strides = [1, 1]} : vector<8x4xf32> to vector<8x1xf32>
      %65 = vector.extract_strided_slice %45 {offsets = [3, 0], sizes = [1, 64], strides = [1, 1]} : vector<4x64xf32> to vector<1x64xf32>
      %66 = vector.broadcast %64 : vector<8x1xf32> to vector<8x64xf32>
      %67 = vector.broadcast %65 : vector<1x64xf32> to vector<8x64xf32>
      %68 = arith.mulf %66, %67 : vector<8x64xf32>
      %69 = arith.addf %63, %68 : vector<8x64xf32>
      %cst_32 = arith.constant 0.000000e+00 : f32
      %70 = vector.broadcast %cst_32 : f32 to vector<8x64xf32>
      %71 = arith.maximumf %69, %70 : vector<8x64xf32>
      %c0_33 = arith.constant 0 : index
      %c0_34 = arith.constant 0 : index
      %72 = vector.load %arg12[%c0_33, %c0_34] : memref<1x64xf32, #tpu.memory_space<vmem>>, vector<1x64xf32>
      %73 = vector.extract_strided_slice %71 {offsets = [0, 0], sizes = [8, 32], strides = [1, 1]} : vector<8x64xf32> to vector<8x32xf32>
      %c0_35 = arith.constant 0 : index
      %c0_36 = arith.constant 0 : index
      %c0_37 = arith.constant 0 : index
      %74 = vector.load %arg11[%c0_35, %c0_36, %c0_37] : memref<2x32x32xf32, #tpu.memory_space<vmem>>, vector<1x32x32xf32>
      %75 = vector.shape_cast %74 : vector<1x32x32xf32> to vector<32x32xf32>
      %cst_38 = arith.constant dense<0.000000e+00> : vector<8x32xf32>
      %76 = tpu.matmul %73, %75, %cst_38 {dimension_numbers = #tpu.dot_dimension_numbers<[1], [0], [0], [1], [0, 0, 1, 1], [], []>} : vector<8x32xf32>, vector<32x32xf32>, vector<8x32xf32> -> vector<8x32xf32>
      %77 = vector.extract_strided_slice %72 {offsets = [0, 0], sizes = [1, 32], strides = [1, 1]} : vector<1x64xf32> to vector<1x32xf32>
      %78 = vector.broadcast %77 : vector<1x32xf32> to vector<8x32xf32>
      %79 = arith.addf %76, %78 : vector<8x32xf32>
      %80 = vector.extract_strided_slice %71 {offsets = [0, 32], sizes = [8, 32], strides = [1, 1]} : vector<8x64xf32> to vector<8x32xf32>
      %c1 = arith.constant 1 : index
      %c0_39 = arith.constant 0 : index
      %c0_40 = arith.constant 0 : index
      %81 = vector.load %arg11[%c1, %c0_39, %c0_40] : memref<2x32x32xf32, #tpu.memory_space<vmem>>, vector<1x32x32xf32>
      %82 = vector.shape_cast %81 : vector<1x32x32xf32> to vector<32x32xf32>
      %cst_41 = arith.constant dense<0.000000e+00> : vector<8x32xf32>
      %83 = tpu.matmul %80, %82, %cst_41 {dimension_numbers = #tpu.dot_dimension_numbers<[1], [0], [0], [1], [0, 0, 1, 1], [], []>} : vector<8x32xf32>, vector<32x32xf32>, vector<8x32xf32> -> vector<8x32xf32>
      %84 = vector.extract_strided_slice %72 {offsets = [0, 32], sizes = [1, 32], strides = [1, 1]} : vector<1x64xf32> to vector<1x32xf32>
      %85 = vector.broadcast %84 : vector<1x32xf32> to vector<8x32xf32>
      %86 = arith.addf %83, %85 : vector<8x32xf32>
      %cst_42 = arith.constant 0.000000e+00 : f32
      %87 = vector.broadcast %cst_42 : f32 to vector<8x32xf32>
      %88 = arith.maximumf %79, %87 : vector<8x32xf32>
      %cst_43 = arith.constant 0.000000e+00 : f32
      %89 = vector.broadcast %cst_43 : f32 to vector<8x32xf32>
      %90 = arith.maximumf %86, %89 : vector<8x32xf32>
      %c0_44 = arith.constant 0 : index
      %c0_45 = arith.constant 0 : index
      %91 = vector.load %arg13[%c0_44, %c0_45] : memref<2x32xf32, #tpu.memory_space<vmem>>, vector<2x32xf32>
      %92 = vector.extract_strided_slice %91 {offsets = [0, 0], sizes = [1, 32], strides = [1, 1]} : vector<2x32xf32> to vector<1x32xf32>
      %93 = vector.broadcast %92 : vector<1x32xf32> to vector<8x32xf32>
      %94 = arith.mulf %88, %93 : vector<8x32xf32>
      %cst_46 = arith.constant dense<0.000000e+00> : vector<8xf32>
      %95 = vector.multi_reduction <add>, %94, %cst_46 [1] : vector<8x32xf32> to vector<8xf32>
      %96 = vector.shape_cast %95 : vector<8xf32> to vector<8x1xf32>
      %97 = vector.extract_strided_slice %91 {offsets = [1, 0], sizes = [1, 32], strides = [1, 1]} : vector<2x32xf32> to vector<1x32xf32>
      %98 = vector.broadcast %97 : vector<1x32xf32> to vector<8x32xf32>
      %99 = arith.mulf %90, %98 : vector<8x32xf32>
      %cst_47 = arith.constant dense<0.000000e+00> : vector<8xf32>
      %100 = vector.multi_reduction <add>, %99, %cst_47 [1] : vector<8x32xf32> to vector<8xf32>
      %101 = vector.shape_cast %100 : vector<8xf32> to vector<8x1xf32>
      %102 = tpu.iota {dimensions = array<i32: 1>} : vector<8x128xi32>
      %c0_i32_48 = arith.constant 0 : i32
      %103 = vector.broadcast %c0_i32_48 : i32 to vector<8x128xi32>
      %104 = arith.cmpi eq, %102, %103 : vector<8x128xi32>
      %c1_i32 = arith.constant 1 : i32
      %105 = vector.broadcast %c1_i32 : i32 to vector<8x128xi32>
      %106 = arith.cmpi eq, %102, %105 : vector<8x128xi32>
      %cst_49 = arith.constant 0.000000e+00 : f32
      %107 = vector.shape_cast %101 : vector<8x1xf32> to vector<8x1xf32>
      %108 = vector.broadcast %107 : vector<8x1xf32> to vector<8x128xf32>
      %109 = vector.broadcast %cst_49 : f32 to vector<8x128xf32>
      %110 = arith.select %106, %108, %109 : vector<8x128xi1>, vector<8x128xf32>
      %111 = vector.shape_cast %96 : vector<8x1xf32> to vector<8x1xf32>
      %112 = vector.broadcast %111 : vector<8x1xf32> to vector<8x128xf32>
      %113 = arith.select %104, %112, %110 : vector<8x128xi1>, vector<8x128xf32>
      %c0_50 = arith.constant 0 : index
      %c0_51 = arith.constant 0 : index
      %114 = vector.load %arg14[%c0_50, %c0_51] : memref<1x128xf32, #tpu.memory_space<vmem>>, vector<1x128xf32>
      %115 = vector.broadcast %114 : vector<1x128xf32> to vector<8x128xf32>
      %116 = arith.addf %113, %115 : vector<8x128xf32>
      %c0_52 = arith.constant 0 : index
      %c0_53 = arith.constant 0 : index
      %117 = vector.load %arg15[%c0_52, %c0_53] : memref<8x128xf32, #tpu.memory_space<vmem>>, vector<8x128xf32>
      tpu.vector_store %arg15[%c0_52, %c0_53], %116 {strides = array<i32>} : memref<8x128xf32, #tpu.memory_space<vmem>>, vector<8x128xf32>,
    } else {
    }
    return
  }
  func.func @transform_0(%arg0: i32, %arg1: i32) -> (i32, i32) {
    %c0_i32 = arith.constant 0 : i32
    return %arg0, %arg1 : i32, i32
  }
  func.func @transform_1(%arg0: i32, %arg1: i32) -> (i32, i32) {
    %c0_i32 = arith.constant 0 : i32
    %c0_i32_0 = arith.constant 0 : i32
    return %arg0, %c0_i32 : i32, i32
  }
  func.func @transform_2(%arg0: i32, %arg1: i32) -> (i32, i32) {
    %c0_i32 = arith.constant 0 : i32
    %c0_i32_0 = arith.constant 0 : i32
    return %arg1, %c0_i32 : i32, i32
  }
  func.func @transform_3(%arg0: i32, %arg1: i32) -> (i32, i32) {
    %c0_i32 = arith.constant 0 : i32
    %c0_i32_0 = arith.constant 0 : i32
    %c0_i32_1 = arith.constant 0 : i32
    return %c0_i32, %c0_i32_0 : i32, i32
  }
  func.func @transform_4(%arg0: i32, %arg1: i32) -> (i32, i32) {
    %c0_i32 = arith.constant 0 : i32
    %c0_i32_0 = arith.constant 0 : i32
    %c0_i32_1 = arith.constant 0 : i32
    return %c0_i32, %c0_i32_0 : i32, i32
  }
  func.func @transform_5(%arg0: i32, %arg1: i32) -> (i32, i32) {
    %c0_i32 = arith.constant 0 : i32
    %c0_i32_0 = arith.constant 0 : i32
    %c0_i32_1 = arith.constant 0 : i32
    return %c0_i32, %c0_i32_0 : i32, i32
  }
  func.func @transform_6(%arg0: i32, %arg1: i32) -> (i32, i32) {
    %c0_i32 = arith.constant 0 : i32
    %c0_i32_0 = arith.constant 0 : i32
    %c0_i32_1 = arith.constant 0 : i32
    return %c0_i32, %c0_i32_0 : i32, i32
  }
  func.func @transform_7(%arg0: i32, %arg1: i32) -> (i32, i32) {
    %c0_i32 = arith.constant 0 : i32
    %c0_i32_0 = arith.constant 0 : i32
    %c0_i32_1 = arith.constant 0 : i32
    return %c0_i32, %c0_i32_0 : i32, i32
  }
  func.func @transform_8(%arg0: i32, %arg1: i32) -> (i32, i32) {
    %c0_i32 = arith.constant 0 : i32
    %c0_i32_0 = arith.constant 0 : i32
    %c0_i32_1 = arith.constant 0 : i32
    return %c0_i32, %c0_i32_0 : i32, i32
  }
  func.func @transform_9(%arg0: i32, %arg1: i32) -> (i32, i32, i32) {
    %c0_i32 = arith.constant 0 : i32
    %c0_i32_0 = arith.constant 0 : i32
    %c0_i32_1 = arith.constant 0 : i32
    %c0_i32_2 = arith.constant 0 : i32
    return %c0_i32, %c0_i32_0, %c0_i32_1 : i32, i32, i32
  }
  func.func @transform_10(%arg0: i32, %arg1: i32) -> (i32, i32) {
    %c0_i32 = arith.constant 0 : i32
    %c0_i32_0 = arith.constant 0 : i32
    %c0_i32_1 = arith.constant 0 : i32
    return %c0_i32, %c0_i32_0 : i32, i32
  }
  func.func @transform_11(%arg0: i32, %arg1: i32) -> (i32, i32) {
    %c0_i32 = arith.constant 0 : i32
    %c0_i32_0 = arith.constant 0 : i32
    %c0_i32_1 = arith.constant 0 : i32
    return %c0_i32, %c0_i32_0 : i32, i32
  }
  func.func @transform_12(%arg0: i32, %arg1: i32) -> (i32, i32) {
    %c0_i32 = arith.constant 0 : i32
    %c0_i32_0 = arith.constant 0 : i32
    %c0_i32_1 = arith.constant 0 : i32
    return %c0_i32, %c0_i32_0 : i32, i32
  }
  func.func @transform_13(%arg0: i32, %arg1: i32) -> (i32, i32) {
    %c0_i32 = arith.constant 0 : i32
    %c0_i32_0 = arith.constant 0 : i32
    return %arg0, %c0_i32 : i32, i32
  }
}

</mosaic_0001>

<bundles_post_ra>
// kernel: tpu_custom_call.1
= control target key start
LH: loop header
LB: loop body
LE: loop exit
PB: predicated region body
PF: predicated region fallthrough
CT: control target
= control target key end

     0   :  { %vm49_vm0 = vcmask 261120   ;;  %v363_v2 = vmov 0.0   ;;  %s543_s0 = inlined_call_operand.vmem [shape: f32[8,64], index: 0, kind: input, shape index: {}]   ;;  %s544_s1 = inlined_call_operand.vmem [shape: f32[8,4], index: 1, kind: input, shape index: {}]   ;;  %s545_s2 = inlined_call_operand.vmem [shape: f32[64,32], index: 2, kind: input, shape index: {}]   ;;  %s546_s3 = inlined_call_operand.vmem [shape: f32[1,32], index: 3, kind: input, shape index: {}]   ;;  %s547_s4 = inlined_call_operand.vmem [shape: f32[1,32], index: 4, kind: input, shape index: {}]   ;;  %s548_s5 = inlined_call_operand.vmem [shape: f32[1,32], index: 5, kind: input, shape index: {}]   ;;  %s549_s6 = inlined_call_operand.vmem [shape: f32[32,64], index: 6, kind: input, shape index: {}]   ;;  %s550_s7 = inlined_call_operand.vmem [shape: f32[4,64], index: 7, kind: input, shape index: {}]   ;;  %s551_s8 = inlined_call_operand.vmem [shape: f32[1,64], index: 8, kind: input, shape index: {}]   ;;  %s552_s9 = inlined_call_operand.vmem [shape: f32[2,32,32], index: 9, kind: input, shape index: {}]   ;;  %s553_s10 = inlined_call_operand.vmem [shape: f32[1,64], index: 10, kind: input, shape index: {}]   ;;  %s554_s11 = inlined_call_operand.vmem [shape: f32[2,32], index: 11, kind: input, shape index: {}]   ;;  %s555_s12 = inlined_call_operand.vmem [shape: f32[1,128], index: 12, kind: input, shape index: {}]   ;;  %s556_s13 = inlined_call_operand.hbm [shape: f32[8,128], index: 13, kind: output, shape index: {}]  }
   0x1   :  { %v59_v0 = vld [vmem:[%s545_s2 + $0x38] sm:$0xff]  ;;  %v58_v1 = vld [vmem:[%s545_s2 + $0x30] sm:$0xff]  ;;  %50 = vst.msk [vmem:[#allocation2] sm:$0xff] %vm49_vm0, %v363_v2  ;;  %v57_v3 = vld [vmem:[%s545_s2 + $0x28] sm:$0xff] }
   0x2   :  { %73 = vmatpush.msra.mxu0 %v59_v0  ;;  %v56_v4 = vld [vmem:[%s545_s2 + $0x20] sm:$0xff] }
   0x4   :  { %74 = vmatpush.msra.mxu0 %v58_v1 }
   0x6   :  { %75 = vmatpush.msra.mxu0 %v57_v3 }
   0x7   :  { %18 = vsyncpa [#allocation4], 0  ;;  %v55_v5 = vld [vmem:[%s545_s2 + $0x18] sm:$0xff]  ;;  %v54_v6 = vld [vmem:[%s545_s2 + $0x10] sm:$0xff]  ;;  %vm61_vm1 = vcmask 523264   ;;  %v364_v17 = vmov 32.0  }
   0x8   :  { %76 = vmatpush.msra.mxu0 %v56_v4  ;;  %v53_v7 = vld [vmem:[%s545_s2 + $0x8] sm:$0xff]  ;;  %v52_v8 = vld [vmem:[%s545_s2] sm:$0xff]  ;;  %331 = vrcp.f32 %v364_v17  ;;  %v140_v29 = vld [vmem:[%s549_s6 + $0x18] sm:$0xff]  ;;  %v365_v37 = vmov 0   ;;  %v366_v38 = vmov 2   ;;  %v367_v39 = vmov 3  }
   0x9   :  { %v51_v9 = vld [vmem:[%s543_s0] sm:$0xff]  ;;  %160 = vmatpush.msra.mxu1 %v140_v29  ;;  %v139_v30 = vld [vmem:[%s549_s6 + $0x10] sm:$0xff]  ;;  %v138_v31 = vld [vmem:[%s549_s6 + $0x8] sm:$0xff]  ;;  %320 = vset.pattern.permute.xlu1 %v365_v37  ;;  %v368_v43 = vmov 1   ;;  %s369_s29 = smov 96   ;;  %s370_s18 = smov [#allocation3]  }
   0xa   :  { %77 = vmatpush.msra.mxu0 %v55_v5  ;;  %v60_v10 = vld [vmem:[#allocation2] sm:$0xff]  ;;  %322 = vset.pattern.permute.xlu2 %v366_v38  ;;  %v204_v54 = vld [vmem:[%s552_s9 + $0x18] sm:$0xff]  ;;  %v203_v55 = vld [vmem:[%s552_s9 + $0x10] sm:$0xff]  ;;  %s293_s19 = sshll.u32 %s370_s18, 4  ;;  %s295_s22 = sshll.u32 %s556_s13, 4  ;;  %s294_s19 = int_to_ptr.vmem [resolvable:$true] %s293_s19  ;;  %s296_s22 = int_to_ptr.hbm [resolvable:$true] %s295_s22 }
   0xb   :  { %v325_v13 = vld [vmem:[%s546_s3] ss:$0 sm:$0xff]  ;;  %161 = vmatpush.msra.mxu1 %v139_v30  ;;  %324 = vset.pattern.permute.xlu0 %v367_v39  ;;  %v202_v56 = vld [vmem:[%s552_s9 + $0x8] sm:$0xff]  ;;  %v310_v59 = vld [vmem:[%s552_s9 + $0x38] sm:$0xff] }
   0xc   :  { %78 = vmatpush.msra.mxu0 %v54_v6  ;;  %v137_v33 = vld [vmem:[%s549_s6] sm:$0xff]  ;;  %223 = vmatpush.msra.mxu2 %v204_v54  ;;  %v309_v60 = vld [vmem:[%s552_s9 + $0x30] sm:$0xff]  ;;  %v308_v61 = vld [vmem:[%s552_s9 + $0x28] sm:$0xff] }
   0xd   :  { %162 = vmatpush.msra.mxu1 %v138_v31  ;;  %v168_v36 = vld [vmem:[%s544_s1] sm:$0xff]  ;;  %255 = vmatpush.msra.mxu3 %v310_v59 }
   0xe   :  { %79 = vmatpush.msra.mxu0 %v53_v7  ;;  %v332_v18 = vpop.eup %331  ;;  %172 = vperm.xlu1 %320, %v168_v36   ;;  %v326_v47 = vld [vmem:[%s547_s4] ss:$0 sm:$0xff] }
   0xf   :  { %v101_v19 = vmul.f32 32.0, %v332_v18  ;;  %vm105_vm2 = vweird.f32 %v332_v18  ;;  %163 = vmatpush.msra.mxu1 %v137_v33  ;;  %186 = vperm.xlu2 %322, %v168_v36   ;;  %v327_v49 = vld [vmem:[%s548_s5] ss:$0 sm:$0xff] }
  0x10   :  { %80 = vmatpush.msra.mxu0 %v52_v8  ;;  %224 = vmatpush.msra.mxu2 %v203_v55  ;;  %v201_v57 = vld [vmem:[%s552_s9] sm:$0xff] }
  0x11   :  { %304 = vmatmul.msk.f32.vlgmr.msra.gmra.mxu0 %vm61_vm1, %v51_v9  ;;  %v102_v20 = vsub.f32 1.0, %v101_v19  ;;  %v329_v58 = vld [vmem:[%s553_s10] ss:$0 sm:$0xff]  ;;  %256 = vmatpush.msra.mxu3 %v309_v60 }
  0x12   :  { %225 = vmatpush.msra.mxu2 %v202_v56  ;;  %v307_v62 = vld [vmem:[%s552_s9 + $0x20] sm:$0xff] }
  0x13   :  { %v103_v21 = vmul.f32 %v332_v18, %v102_v20  ;;  %257 = vmatpush.msra.mxu3 %v308_v61  ;;  %v169_v1 = vld [vmem:[%s550_s7] sm:$0xf] }
  0x14   :  { %226 = vmatpush.msra.mxu2 %v201_v57  ;;  %v175_v2 = vperm.slane %v169_v1, 0  ;;  %v328_v3 = vld [vmem:[%s551_s8] ss:$0 sm:$0xff]  ;;  %v182_v4 = vperm.slane %v169_v1, 1  ;;  %v189_v6 = vperm.slane %v169_v1, 2 }
  0x15   :  { %v104_v22 = vadd.f32 %v332_v18, %v103_v21  ;;  %258 = vmatpush.msra.mxu3 %v307_v62  ;;  %v265_v21 = vld [vmem:[%s554_s11] sm:$0x3] }
  0x16   :  { %321 = vset.pattern.permute.xlu1 %v368_v43  ;;  %v271_v31 = vperm.slane %v265_v21, 1  ;;  %v330_v37 = vld [vmem:[%s555_s12] ss:$0 sm:$0xff] }
  0x17   :  { %v106_v23 = vsel %vm105_vm2, %v332_v18, %v104_v22  ;;  %323 = vset.pattern.permute.xlu2 %v367_v39  ;;  %179 = vperm.xlu1 %321, %v168_v36  }
  0x18   :  { %193 = vperm.xlu2 %323, %v168_v36  }
  0x1f   :  { %238 = vrot.lane.b32.xlu1 %v329_v58, %s369_s29 }
  0x69   :  { %v187_v0 = vpop.permute.xlu2 %186 }
  0x80   :  { %v173_v63 = vpop.permute.xlu1 %172 }
  0x81   :  { %v176_v8 = vmul.f32 %v175_v2, %v173_v63 }
  0x89   :  { %v180_v5 = vpop.permute.xlu1 %179 }
  0x8e   :  { %v82_v11 = vpop.f32.mrf.mxu0 }
  0x8f   :  { %v85_v12 = vadd.f32 %v82_v11, %v60_v10  ;;  %v183_v10 = vmul.f32 %v182_v4, %v180_v5  ;;  %v196_v11 = vperm.slane %v169_v1, 3 }
  0x91   :  { %87 = vst.msk [vmem:[#allocation2] sm:$0xff] %vm49_vm0, %v85_v12  ;;  %v194_v12 = vpop.permute.xlu2 %193 }
  0x98   :  { %v91_v14 = vld [vmem:[#allocation2] sm:$0xff] }
  0x99   :  { %v96_v15 = vadd.f32 %v325_v13, %v91_v14  ;;  %v190_v14 = vmul.f32 %v189_v6, %v187_v0 }
  0x9b   :  { %v97_v16 = vsel %vm49_vm0, %v96_v15, 0.0 }
  0x9c   :  { %98 = vadd.xlane.f32.xlu0 %v97_v16  ;;  %v197_v16 = vmul.f32 %v196_v11, %v194_v12 }
 0x10f   :  { %v99_v24 = vpop.xlane.xlu0 %98 }
 0x110   :  { %v107_v25 = vmul.f32 %v106_v23, %v99_v24  ;;  %v266_v24 = vperm.slane %v265_v21, 0 }
 0x112   :  { %v108_v26 = vsub.f32 %v96_v15, %v107_v25 }
 0x114   :  { %v109_v27 = vmul.f32 %v108_v26, %v108_v26 }
 0x116   :  { %v110_v28 = vsel %vm49_vm0, %v109_v27, 0.0 }
 0x117   :  { %111 = vadd.xlane.f32.xlu0 %v110_v28  ;;  %v239_v28 = vpop.permute.xlu1 %238 }
 0x18a   :  { %v112_v32 = vpop.xlane.xlu0 %111 }
 0x18b   :  { %v113_v34 = vmul.f32 %v112_v32, %v106_v23 }
 0x18d   :  { %v114_v35 = vadd.f32 1e-05, %v113_v34 }
 0x18f   :  { %333 = vrsqrt.f32 %v114_v35  ;;  %vm121_vm4 = vweird.f32 %v114_v35 }
 0x195   :  { %v334_v40 = vpop.eup %333 }
 0x196   :  { %v116_v41 = vmul.f32 %v334_v40, %v114_v35  ;;  %vm122_vm3 = vweird.f32 %v334_v40  ;;  %v276_v35 = vlaneseq }
 0x197   :  { %vm123_vm5 = vmor %vm121_vm4, %vm122_vm3 }
 0x198   :  { %v117_v42 = vmul.f32 %v334_v40, %v116_v41  ;;  %v277_v36 = vand.u32 127, %v276_v35 }
 0x19a   :  { %v118_v44 = vmul.f32 0.5, %v117_v42  ;;  %vm279_vm6 = vcmp.eq.s32.totalorder %v277_v36, 1  ;;  %vm278_vm7 = vcmp.eq.s32.totalorder %v277_v36, 0 }
 0x19c   :  { %v119_v45 = vsub.f32 1.5, %v118_v44 }
 0x19e   :  { %v120_v46 = vmul.f32 %v334_v40, %v119_v45 }
 0x1a0   :  { %v124_v48 = vsel %vm123_vm5, %v334_v40, %v120_v46 }
 0x1a1   :  { %v125_v50 = vmul.f32 %v124_v48, %v108_v26 }
 0x1a3   :  { %v130_v51 = vmul.f32 %v326_v47, %v125_v50 }
 0x1a5   :  { %v135_v52 = vadd.f32 %v327_v49, %v130_v51 }
 0x1a7   :  { %335 = vtanh.f32 %v135_v52 }
 0x1ad   :  { %v336_v53 = vpop.eup %335 }
 0x1ae   :  { %305 = vmatmul.msk.f32.vlgmr.msra.gmra.mxu1 %vm49_vm0, %v336_v53 }
 0x22b   :  { %v165_v7 = vpop.f32.mrf.mxu1 }
 0x22c   :  { %v166_v9 = vadd.f32 %v328_v3, %v165_v7 }
 0x22e   :  { %v177_v13 = vadd.f32 %v176_v8, %v166_v9 }
 0x230   :  { %v184_v15 = vadd.f32 %v183_v10, %v177_v13 }
 0x232   :  { %v191_v17 = vadd.f32 %v190_v14, %v184_v15 }
 0x234   :  { %v198_v18 = vadd.f32 %v197_v16, %v191_v17 }
 0x236   :  { %v199_v19 = vmax.f32 %v198_v18, 0.0 }
 0x238   :  { %236 = vrot.lane.b32.xlu0 %v199_v19, %s369_s29  ;;  %306 = vmatmul.msk.f32.vlgmr.msra.gmra.mxu2 %vm49_vm0, %v199_v19 }
 0x2aa   :  { %v237_v20 = vpop.permute.xlu0 %236 }
 0x2ab   :  { %311 = vmatmul.msk.f32.vlgmr.msra.gmra.mxu3 %vm49_vm0, %v237_v20 }
 0x2bb   :  { %v228_v22 = vpop.f32.mrf.mxu2 }
 0x2bc   :  { %v229_v23 = vadd.f32 %v329_v58, %v228_v22 }
 0x2be   :  { %v263_v25 = vmax.f32 %v229_v23, 0.0 }
 0x2c0   :  { %v267_v26 = vmul.f32 %v266_v24, %v263_v25 }
 0x2c2   :  { %v268_v27 = vsel %vm49_vm0, %v267_v26, 0.0 }
 0x2c3   :  { %269 = vadd.xlane.f32.xlu1 %v268_v27 }
 0x32e   :  { %v260_v29 = vpop.f32.mrf.mxu3 }
 0x32f   :  { %v261_v30 = vadd.f32 %v260_v29, %v239_v28 }
 0x331   :  { %v264_v32 = vmax.f32 %v261_v30, 0.0 }
 0x333   :  { %v272_v33 = vmul.f32 %v271_v31, %v264_v32 }
 0x335   :  { %v273_v34 = vsel %vm49_vm0, %v272_v33, 0.0 }
 0x336   :  { %274 = vadd.xlane.f32.xlu2 %v273_v34  ;;  %v270_v39 = vpop.xlane.xlu1 %269 }
 0x3a9   :  { %v275_v38 = vpop.xlane.xlu2 %274 }
 0x3aa   :  { %v280_v40 = vsel %vm279_vm6, %v275_v38, 0.0 }
 0x3ab   :  { %v281_v41 = vsel %vm278_vm7, %v270_v39, %v280_v40 }
 0x3ac   :  { %v286_v42 = vadd.f32 %v330_v37, %v281_v41 }
 0x3ae   :  { %287 = vst [vmem:[#allocation3] sm:$0xff] %v286_v42 }
 0x3af   :  { %298 = dma.vmem_to_hbm [thread:$0]  %s294_s19, 128, %s296_s22, [#allocation4]  }
 0x3b0   :  { %361 = dma.done.wait [#allocation4], 128  }
 0x3b1   :  { %362 = vsyncadd [#allocation4], 4294967168 }
 0x3b2   :  { %303 = vsyncpa [#allocation4], 1 }

// kernel: tpu_custom_call.1
= control target key start
LH: loop header
LB: loop body
LE: loop exit
PB: predicated region body
PF: predicated region fallthrough
CT: control target
= control target key end

     0   :  { %vm49_vm0 = vcmask 261120   ;;  %v363_v2 = vmov 0.0   ;;  %s543_s0 = inlined_call_operand.vmem [shape: f32[8,64], index: 0, kind: input, shape index: {}]   ;;  %s544_s1 = inlined_call_operand.vmem [shape: f32[8,4], index: 1, kind: input, shape index: {}]   ;;  %s545_s2 = inlined_call_operand.vmem [shape: f32[64,32], index: 2, kind: input, shape index: {}]   ;;  %s546_s3 = inlined_call_operand.vmem [shape: f32[1,32], index: 3, kind: input, shape index: {}]   ;;  %s547_s4 = inlined_call_operand.vmem [shape: f32[1,32], index: 4, kind: input, shape index: {}]   ;;  %s548_s5 = inlined_call_operand.vmem [shape: f32[1,32], index: 5, kind: input, shape index: {}]   ;;  %s549_s6 = inlined_call_operand.vmem [shape: f32[32,64], index: 6, kind: input, shape index: {}]   ;;  %s550_s7 = inlined_call_operand.vmem [shape: f32[4,64], index: 7, kind: input, shape index: {}]   ;;  %s551_s8 = inlined_call_operand.vmem [shape: f32[1,64], index: 8, kind: input, shape index: {}]   ;;  %s552_s9 = inlined_call_operand.vmem [shape: f32[2,32,32], index: 9, kind: input, shape index: {}]   ;;  %s553_s10 = inlined_call_operand.vmem [shape: f32[1,64], index: 10, kind: input, shape index: {}]   ;;  %s554_s11 = inlined_call_operand.vmem [shape: f32[2,32], index: 11, kind: input, shape index: {}]   ;;  %s555_s12 = inlined_call_operand.vmem [shape: f32[1,128], index: 12, kind: input, shape index: {}]   ;;  %s556_s13 = inlined_call_operand.hbm [shape: f32[8,128], index: 13, kind: output, shape index: {}]  }
   0x1   :  { %v59_v0 = vld [vmem:[%s545_s2 + $0x38] sm:$0xff]  ;;  %v58_v1 = vld [vmem:[%s545_s2 + $0x30] sm:$0xff]  ;;  %50 = vst.msk [vmem:[#allocation2] sm:$0xff] %vm49_vm0, %v363_v2  ;;  %v57_v3 = vld [vmem:[%s545_s2 + $0x28] sm:$0xff] }
   0x2   :  { %73 = vmatpush.msra.mxu0 %v59_v0  ;;  %v56_v4 = vld [vmem:[%s545_s2 + $0x20] sm:$0xff] }
   0x4   :  { %74 = vmatpush.msra.mxu0 %v58_v1 }
   0x6   :  { %75 = vmatpush.msra.mxu0 %v57_v3 }
   0x7   :  { %18 = vsyncpa [#allocation4], 0  ;;  %v55_v5 = vld [vmem:[%s545_s2 + $0x18] sm:$0xff]  ;;  %v54_v6 = vld [vmem:[%s545_s2 + $0x10] sm:$0xff]  ;;  %vm61_vm1 = vcmask 523264   ;;  %v364_v17 = vmov 32.0  }
   0x8   :  { %76 = vmatpush.msra.mxu0 %v56_v4  ;;  %v53_v7 = vld [vmem:[%s545_s2 + $0x8] sm:$0xff]  ;;  %v52_v8 = vld [vmem:[%s545_s2] sm:$0xff]  ;;  %331 = vrcp.f32 %v364_v17  ;;  %v140_v29 = vld [vmem:[%s549_s6 + $0x18] sm:$0xff]  ;;  %v365_v37 = vmov 0   ;;  %v366_v38 = vmov 2   ;;  %v367_v39 = vmov 3  }
   0x9   :  { %v51_v9 = vld [vmem:[%s543_s0] sm:$0xff]  ;;  %160 = vmatpush.msra.mxu1 %v140_v29  ;;  %v139_v30 = vld [vmem:[%s549_s6 + $0x10] sm:$0xff]  ;;  %v138_v31 = vld [vmem:[%s549_s6 + $0x8] sm:$0xff]  ;;  %320 = vset.pattern.permute.xlu1 %v365_v37  ;;  %v368_v43 = vmov 1   ;;  %s369_s29 = smov 96   ;;  %s370_s18 = smov [#allocation3]  }
   0xa   :  { %77 = vmatpush.msra.mxu0 %v55_v5  ;;  %v60_v10 = vld [vmem:[#allocation2] sm:$0xff]  ;;  %322 = vset.pattern.permute.xlu2 %v366_v38  ;;  %v204_v54 = vld [vmem:[%s552_s9 + $0x18] sm:$0xff]  ;;  %v203_v55 = vld [vmem:[%s552_s9 + $0x10] sm:$0xff]  ;;  %s293_s19 = sshll.u32 %s370_s18, 4  ;;  %s295_s22 = sshll.u32 %s556_s13, 4  ;;  %s294_s19 = int_to_ptr.vmem [resolvable:$true] %s293_s19  ;;  %s296_s22 = int_to_ptr.hbm [resolvable:$true] %s295_s22 }
   0xb   :  { %v325_v13 = vld [vmem:[%s546_s3] ss:$0 sm:$0xff]  ;;  %161 = vmatpush.msra.mxu1 %v139_v30  ;;  %324 = vset.pattern.permute.xlu0 %v367_v39  ;;  %v202_v56 = vld [vmem:[%s552_s9 + $0x8] sm:$0xff]  ;;  %v310_v59 = vld [vmem:[%s552_s9 + $0x38] sm:$0xff] }
   0xc   :  { %78 = vmatpush.msra.mxu0 %v54_v6  ;;  %v137_v33 = vld [vmem:[%s549_s6] sm:$0xff]  ;;  %223 = vmatpush.msra.mxu2 %v204_v54  ;;  %v309_v60 = vld [vmem:[%s552_s9 + $0x30] sm:$0xff]  ;;  %v308_v61 = vld [vmem:[%s552_s9 + $0x28] sm:$0xff] }
   0xd   :  { %162 = vmatpush.msra.mxu1 %v138_v31  ;;  %v168_v36 = vld [vmem:[%s544_s1] sm:$0xff]  ;;  %255 = vmatpush.msra.mxu3 %v310_v59 }
   0xe   :  { %79 = vmatpush.msra.mxu0 %v53_v7  ;;  %v332_v18 = vpop.eup %331  ;;  %172 = vperm.xlu1 %320, %v168_v36   ;;  %v326_v47 = vld [vmem:[%s547_s4] ss:$0 sm:$0xff] }
   0xf   :  { %v101_v19 = vmul.f32 32.0, %v332_v18  ;;  %vm105_vm2 = vweird.f32 %v332_v18  ;;  %163 = vmatpush.msra.mxu1 %v137_v33  ;;  %186 = vperm.xlu2 %322, %v168_v36   ;;  %v327_v49 = vld [vmem:[%s548_s5] ss:$0 sm:$0xff] }
  0x10   :  { %80 = vmatpush.msra.mxu0 %v52_v8  ;;  %224 = vmatpush.msra.mxu2 %v203_v55  ;;  %v201_v57 = vld [vmem:[%s552_s9] sm:$0xff] }
  0x11   :  { %304 = vmatmul.msk.f32.vlgmr.msra.gmra.mxu0 %vm61_vm1, %v51_v9  ;;  %v102_v20 = vsub.f32 1.0, %v101_v19  ;;  %v329_v58 = vld [vmem:[%s553_s10] ss:$0 sm:$0xff]  ;;  %256 = vmatpush.msra.mxu3 %v309_v60 }
  0x12   :  { %225 = vmatpush.msra.mxu2 %v202_v56  ;;  %v307_v62 = vld [vmem:[%s552_s9 + $0x20] sm:$0xff] }
  0x13   :  { %v103_v21 = vmul.f32 %v332_v18, %v102_v20  ;;  %257 = vmatpush.msra.mxu3 %v308_v61  ;;  %v169_v1 = vld [vmem:[%s550_s7] sm:$0xf] }
  0x14   :  { %226 = vmatpush.msra.mxu2 %v201_v57  ;;  %v175_v2 = vperm.slane %v169_v1, 0  ;;  %v328_v3 = vld [vmem:[%s551_s8] ss:$0 sm:$0xff]  ;;  %v182_v4 = vperm.slane %v169_v1, 1  ;;  %v189_v6 = vperm.slane %v169_v1, 2 }
  0x15   :  { %v104_v22 = vadd.f32 %v332_v18, %v103_v21  ;;  %258 = vmatpush.msra.mxu3 %v307_v62  ;;  %v265_v21 = vld [vmem:[%s554_s11] sm:$0x3] }
  0x16   :  { %321 = vset.pattern.permute.xlu1 %v368_v43  ;;  %v271_v31 = vperm.slane %v265_v21, 1  ;;  %v330_v37 = vld [vmem:[%s555_s12] ss:$0 sm:$0xff] }
  0x17   :  { %v106_v23 = vsel %vm105_vm2, %v332_v18, %v104_v22  ;;  %323 = vset.pattern.permute.xlu2 %v367_v39  ;;  %179 = vperm.xlu1 %321, %v168_v36  }
  0x18   :  { %193 = vperm.xlu2 %323, %v168_v36  }
  0x1f   :  { %238 = vrot.lane.b32.xlu1 %v329_v58, %s369_s29 }
  0x69   :  { %v187_v0 = vpop.permute.xlu2 %186 }
  0x80   :  { %v173_v63 = vpop.permute.xlu1 %172 }
  0x81   :  { %v176_v8 = vmul.f32 %v175_v2, %v173_v63 }
  0x89   :  { %v180_v5 = vpop.permute.xlu1 %179 }
  0x8e   :  { %v82_v11 = vpop.f32.mrf.mxu0 }
  0x8f   :  { %v85_v12 = vadd.f32 %v82_v11, %v60_v10  ;;  %v183_v10 = vmul.f32 %v182_v4, %v180_v5  ;;  %v196_v11 = vperm.slane %v169_v1, 3 }
  0x91   :  { %87 = vst.msk [vmem:[#allocation2] sm:$0xff] %vm49_vm0, %v85_v12  ;;  %v194_v12 = vpop.permute.xlu2 %193 }
  0x98   :  { %v91_v14 = vld [vmem:[#allocation2] sm:$0xff] }
  0x99   :  { %v96_v15 = vadd.f32 %v325_v13, %v91_v14  ;;  %v190_v14 = vmul.f32 %v189_v6, %v187_v0 }
  0x9b   :  { %v97_v16 = vsel %vm49_vm0, %v96_v15, 0.0 }
  0x9c   :  { %98 = vadd.xlane.f32.xlu0 %v97_v16  ;;  %v197_v16 = vmul.f32 %v196_v11, %v194_v12 }
 0x10f   :  { %v99_v24 = vpop.xlane.xlu0 %98 }
 0x110   :  { %v107_v25 = vmul.f32 %v106_v23, %v99_v24  ;;  %v266_v24 = vperm.slane %v265_v21, 0 }
 0x112   :  { %v108_v26 = vsub.f32 %v96_v15, %v107_v25 }
 0x114   :  { %v109_v27 = vmul.f32 %v108_v26, %v108_v26 }
 0x116   :  { %v110_v28 = vsel %vm49_vm0, %v109_v27, 0.0 }
 0x117   :  { %111 = vadd.xlane.f32.xlu0 %v110_v28  ;;  %v239_v28 = vpop.permute.xlu1 %238 }
 0x18a   :  { %v112_v32 = vpop.xlane.xlu0 %111 }
 0x18b   :  { %v113_v34 = vmul.f32 %v112_v32, %v106_v23 }
 0x18d   :  { %v114_v35 = vadd.f32 1e-05, %v113_v34 }
 0x18f   :  { %333 = vrsqrt.f32 %v114_v35  ;;  %vm121_vm4 = vweird.f32 %v114_v35 }
 0x195   :  { %v334_v40 = vpop.eup %333 }
 0x196   :  { %v116_v41 = vmul.f32 %v334_v40, %v114_v35  ;;  %vm122_vm3 = vweird.f32 %v334_v40  ;;  %v276_v35 = vlaneseq }
 0x197   :  { %vm123_vm5 = vmor %vm121_vm4, %vm122_vm3 }
 0x198   :  { %v117_v42 = vmul.f32 %v334_v40, %v116_v41  ;;  %v277_v36 = vand.u32 127, %v276_v35 }
 0x19a   :  { %v118_v44 = vmul.f32 0.5, %v117_v42  ;;  %vm279_vm6 = vcmp.eq.s32.totalorder %v277_v36, 1  ;;  %vm278_vm7 = vcmp.eq.s32.totalorder %v277_v36, 0 }
 0x19c   :  { %v119_v45 = vsub.f32 1.5, %v118_v44 }
 0x19e   :  { %v120_v46 = vmul.f32 %v334_v40, %v119_v45 }
 0x1a0   :  { %v124_v48 = vsel %vm123_vm5, %v334_v40, %v120_v46 }
 0x1a1   :  { %v125_v50 = vmul.f32 %v124_v48, %v108_v26 }
 0x1a3   :  { %v130_v51 = vmul.f32 %v326_v47, %v125_v50 }
 0x1a5   :  { %v135_v52 = vadd.f32 %v327_v49, %v130_v51 }
 0x1a7   :  { %335 = vtanh.f32 %v135_v52 }
 0x1ad   :  { %v336_v53 = vpop.eup %335 }
 0x1ae   :  { %305 = vmatmul.msk.f32.vlgmr.msra.gmra.mxu1 %vm49_vm0, %v336_v53 }
 0x22b   :  { %v165_v7 = vpop.f32.mrf.mxu1 }
 0x22c   :  { %v166_v9 = vadd.f32 %v328_v3, %v165_v7 }
 0x22e   :  { %v177_v13 = vadd.f32 %v176_v8, %v166_v9 }
 0x230   :  { %v184_v15 = vadd.f32 %v183_v10, %v177_v13 }
 0x232   :  { %v191_v17 = vadd.f32 %v190_v14, %v184_v15 }
 0x234   :  { %v198_v18 = vadd.f32 %v197_v16, %v191_v17 }
 0x236   :  { %v199_v19 = vmax.f32 %v198_v18, 0.0 }
 0x238   :  { %236 = vrot.lane.b32.xlu0 %v199_v19, %s369_s29  ;;  %306 = vmatmul.msk.f32.vlgmr.msra.gmra.mxu2 %vm49_vm0, %v199_v19 }
 0x2aa   :  { %v237_v20 = vpop.permute.xlu0 %236 }
 0x2ab   :  { %311 = vmatmul.msk.f32.vlgmr.msra.gmra.mxu3 %vm49_vm0, %v237_v20 }
 0x2bb   :  { %v228_v22 = vpop.f32.mrf.mxu2 }
 0x2bc   :  { %v229_v23 = vadd.f32 %v329_v58, %v228_v22 }
 0x2be   :  { %v263_v25 = vmax.f32 %v229_v23, 0.0 }
 0x2c0   :  { %v267_v26 = vmul.f32 %v266_v24, %v263_v25 }
 0x2c2   :  { %v268_v27 = vsel %vm49_vm0, %v267_v26, 0.0 }
 0x2c3   :  { %269 = vadd.xlane.f32.xlu1 %v268_v27 }
 0x32e   :  { %v260_v29 = vpop.f32.mrf.mxu3 }
 0x32f   :  { %v261_v30 = vadd.f32 %v260_v29, %v239_v28 }
 0x331   :  { %v264_v32 = vmax.f32 %v261_v30, 0.0 }
 0x333   :  { %v272_v33 = vmul.f32 %v271_v31, %v264_v32 }
 0x335   :  { %v273_v34 = vsel %vm49_vm0, %v272_v33, 0.0 }
 0x336   :  { %274 = vadd.xlane.f32.xlu2 %v273_v34  ;;  %v270_v39 = vpop.xlane.xlu1 %269 }
 0x3a9   :  { %v275_v38 = vpop.xlane.xlu2 %274 }
 0x3aa   :  { %v280_v40 = vsel %vm279_vm6, %v275_v38, 0.0 }
 0x3ab   :  { %v281_v41 = vsel %vm278_vm7, %v270_v39, %v280_v40 }
 0x3ac   :  { %v286_v42 = vadd.f32 %v330_v37, %v281_v41 }
 0x3ae   :  { %287 = vst [vmem:[#allocation3] sm:$0xff] %v286_v42 }
 0x3af   :  { %298 = dma.vmem_to_hbm [thread:$0]  %s294_s19, 128, %s296_s22, [#allocation4]  }
 0x3b0   :  { %361 = dma.done.wait [#allocation4], 128  }
 0x3b1   :  { %362 = vsyncadd [#allocation4], 4294967168 }
 0x3b2   :  { %303 = vsyncpa [#allocation4], 1 }

</bundles_post_ra>
